<compile_context>
chip_gen: v5e
topology: v5e:2x2
jax: 0.10.0
libtpu: 0.0.40
codegen_flags: <defaults>
</compile_context>

<pallas_src>
import math
import functools

import jax
import jax.numpy as jnp
from jax.experimental import pallas as pl
from jax.experimental.pallas import tpu as pltpu


def _encoder_block_kernel(
    x_ref,              # (Bb, S, E) f32  current batch block (rows ordered (b, s))
    wqkv_ref,           # (E, 3E) bf16  fused [Wq | Wk | Wv], pre-transposed: y = x @ W
    bqkv_ref,           # (1, 3E) f32
    wo_ref,             # (E, E)  bf16  output projection
    bo_ref,             # (1, E)  f32
    g1_ref, beta1_ref,  # (1, E)  LayerNorm1 gamma / beta
    w1_ref, b1_ref,     # (E, F) bf16 / (1, F) f32
    w2_ref, b2_ref,     # (F, E) bf16 / (1, E) f32
    g2_ref, beta2_ref,  # (1, E)  LayerNorm2 gamma / beta
    o_ref,              # (Bb, S, E) f32
    *, num_heads: int,
):
    Bb, S, E = x_ref.shape
    H = num_heads
    D = E // H
    R = Bb * S
    scale = 1.0 / math.sqrt(D)

    # Free leading-dim collapse: rows ordered (b, s).
    x = x_ref[...].reshape(R, E)                                          # (R, E) f32

    # ---- fused QKV projection: one (R,E)x(E,3E) bf16 MXU pass, f32 accumulation ----
    qkv = jnp.dot(x.astype(jnp.bfloat16), wqkv_ref[...],
                  preferred_element_type=jnp.float32) + bqkv_ref[...]     # (R, 3E) f32
    qkv_bf = qkv.astype(jnp.bfloat16)          # single lane-dense bf16 cast

    # ---- per-head attention, batched over the Bb batch elements in each einsum ----
    # (H is small; scores / AV intermediates of each head die inside its iteration,
    #  only the (Bb, S, D) bf16 head output stays live for the concat.)
    head_outs = []
    for h in range(H):
        qh = qkv_bf[:,         h * D:         (h + 1) * D].reshape(Bb, S, D)
        kh = qkv_bf[:, E     + h * D: E     + (h + 1) * D].reshape(Bb, S, D)
        vh = qkv_bf[:, 2 * E + h * D: 2 * E + (h + 1) * D].reshape(Bb, S, D)

        s = jnp.einsum('bsd,btd->bst', qh, kh,
                       preferred_element_type=jnp.float32) * scale        # (Bb, S, S)
        s = s - jnp.max(s, axis=-1, keepdims=True)
        p = jnp.exp(s)
        p = p * pl.reciprocal(jnp.sum(p, axis=-1, keepdims=True), approx=True)

        oh = jnp.einsum('bst,btd->bsd', p.astype(jnp.bfloat16), vh,
                        preferred_element_type=jnp.float32)               # (Bb, S, D)
        head_outs.append(oh.astype(jnp.bfloat16))

    # Lane-contiguous head concat, then ONE K=E output-projection matmul.
    heads = jnp.concatenate(head_outs, axis=-1).reshape(R, E)             # (R, E) bf16
    attn = jnp.dot(heads, wo_ref[...],
                   preferred_element_type=jnp.float32) + bo_ref[...]      # (R, E) f32

    # ---- residual + LayerNorm1  (dropout = identity, eval semantics) ----
    x1 = x + attn
    mu1 = jnp.mean(x1, axis=-1, keepdims=True)
    var1 = jnp.mean((x1 - mu1) ** 2, axis=-1, keepdims=True)
    x1n = (x1 - mu1) * jax.lax.rsqrt(var1 + 1e-5) * g1_ref[...] + beta1_ref[...]

    # ---- FFN: Linear -> ReLU -> Linear (bf16 matmul inputs, f32 accumulation) ----
    h1 = jnp.dot(x1n.astype(jnp.bfloat16), w1_ref[...],
                 preferred_element_type=jnp.float32) + b1_ref[...]
    h1 = jnp.maximum(h1, 0.0)
    ff = jnp.dot(h1.astype(jnp.bfloat16), w2_ref[...],
                 preferred_element_type=jnp.float32) + b2_ref[...]

    # ---- residual + LayerNorm2 ----
    x2 = x1n + ff
    mu2 = jnp.mean(x2, axis=-1, keepdims=True)
    var2 = jnp.mean((x2 - mu2) ** 2, axis=-1, keepdims=True)
    y = (x2 - mu2) * jax.lax.rsqrt(var2 + 1e-5) * g2_ref[...] + beta2_ref[...]

    o_ref[...] = y.reshape(Bb, S, E)


def self_attention_module(x_sbe, params, num_heads, *, batch_tile=None,
                          vmem_limit_bytes=64 * 1024 * 1024):
    """x_sbe: (S, B, E) float32, matching PyTorch nn.MultiheadAttention layout.

    batch_tile = sequences per grid step (block = (batch_tile, S, E)).  Default
    targets ~512 rows per step; weights stay resident (constant index_maps)
    while the x / o activation tiles stream and double-buffer across the grid.
    """
    S, B, E = x_sbe.shape
    F = params["w1"].shape[1]
    H = num_heads
    assert E % H == 0

    if batch_tile is None:
        batch_tile = max(1, min(B, max(1, 512 // S)))
    batch_tile = min(batch_tile, B)
    while B % batch_tile:
        batch_tile -= 1
    Bb = batch_tile
    grid = (B // Bb,)

    # (S, B, E) -> (B, S, E): rows become (b, s)-ordered for leading-batch einsums.
    # TODO(synk): keep the module boundary in (B, S, E) end-to-end to avoid this pass.
    x_bse = jnp.transpose(x_sbe, (1, 0, 2))

    bf16 = jnp.bfloat16
    wqkv = jnp.concatenate([params["wq"], params["wk"], params["wv"]], axis=1).astype(bf16)
    bqkv = jnp.concatenate([params["bq"], params["bk"], params["bv"]], axis=1)
    wo = params["wo"].astype(bf16)
    w1 = params["w1"].astype(bf16)
    w2 = params["w2"].astype(bf16)

    def fixed(shape):
        n = len(shape)
        return pl.BlockSpec(shape, lambda i, _n=n: (0,) * _n)   # resident operand

    kernel = functools.partial(_encoder_block_kernel, num_heads=H)

    out_bse = pl.pallas_call(
        kernel,
        out_shape=jax.ShapeDtypeStruct((B, S, E), jnp.float32),
        grid_spec=pltpu.PrefetchScalarGridSpec(
            num_scalar_prefetch=0,
            grid=grid,
            in_specs=[
                pl.BlockSpec((Bb, S, E), lambda i: (i, 0, 0)),   # x  (streamed)
                fixed((E, 3 * E)), fixed((1, 3 * E)),            # wqkv, bqkv
                fixed((E, E)), fixed((1, E)),                    # wo, bo
                fixed((1, E)), fixed((1, E)),                    # ln1 gamma, beta
                fixed((E, F)), fixed((1, F)),                    # w1, b1
                fixed((F, E)), fixed((1, E)),                    # w2, b2
                fixed((1, E)), fixed((1, E)),                    # ln2 gamma, beta
            ],
            out_specs=pl.BlockSpec((Bb, S, E), lambda i: (i, 0, 0)),
        ),
        compiler_params=pltpu.CompilerParams(
            dimension_semantics=("parallel",),
            vmem_limit_bytes=vmem_limit_bytes),
    )(
        x_bse, wqkv, bqkv, wo, params["bo"],
        params["ln1_g"], params["ln1_b"],
        w1, params["b1"], w2, params["b2"],
        params["ln2_g"], params["ln2_b"],
    )
    return jnp.transpose(out_bse, (1, 0, 2))   # back to (S, B, E)


def make_params(key, embed_dim, ff_hidden_dim):
    E, F = embed_dim, ff_hidden_dim
    ks = jax.random.split(key, 8)
    scale = 0.05
    # Weights stored already transposed (input_dim, output_dim) so the kernel
    # computes y = x @ W + b (PyTorch stores (out, in) and does x @ W^T).
    return {
        "wq": scale * jax.random.normal(ks[0], (E, E), jnp.float32),
        "wk": scale * jax.random.normal(ks[1], (E, E), jnp.float32),
        "wv": scale * jax.random.normal(ks[2], (E, E), jnp.float32),
        "bq": jnp.zeros((1, E), jnp.float32),
        "bk": jnp.zeros((1, E), jnp.float32),
        "bv": jnp.zeros((1, E), jnp.float32),
        "wo": scale * jax.random.normal(ks[3], (E, E), jnp.float32),
        "bo": 0.01 * jnp.ones((1, E), jnp.float32),
        "ln1_g": jnp.ones((1, E), jnp.float32),
        "ln1_b": jnp.zeros((1, E), jnp.float32),
        "w1": scale * jax.random.normal(ks[4], (E, F), jnp.float32),
        "b1": 0.01 * jnp.ones((1, F), jnp.float32),
        "w2": scale * jax.random.normal(ks[5], (F, E), jnp.float32),
        "b2": 0.01 * jnp.ones((1, E), jnp.float32),
        "ln2_g": jnp.ones((1, E), jnp.float32),
        "ln2_b": jnp.zeros((1, E), jnp.float32),
    }


if __name__ == "__main__":
    # Small shapes: seq=8, batch=2, embed=32, heads=4, ff_hidden=64.
    # (Note: real-hardware benchmarking needs E/F/S as multiples of 128 — these toy
    #  shapes run on masked sub-128-lane vregs and only validate correctness/compile.)
    S, B, E, H, F = 8, 2, 32, 4, 64
    key = jax.random.PRNGKey(0)
    kx, kp = jax.random.split(key)
    x = jax.random.normal(kx, (S, B, E), jnp.float32)   # (seq, batch, embed)
    params = make_params(kp, E, F)

    # batch_tile=1 -> grid=(2,): exercises the streamed x/o tiles + resident weights.
    out = self_attention_module(x, params, num_heads=H, batch_tile=1)
    out = jax.block_until_ready(out)
    assert out.shape == (S, B, E)
    assert bool(jnp.isfinite(out).all())
    # TODO(synk): dropout is implemented as identity (inference mode); training-mode
    # stochastic dropout would need pltpu.prng_* inside the kernel.
    print("KERNEL_OK")
</pallas_src>

<mosaic_0001>
module attributes {stable_mosaic.version = 11 : i64} {
  func.func @_encoder_block_kernel(%arg0: i32, %arg1: memref<1x8x32xf32, #tpu.memory_space<vmem>>, %arg2: memref<32x96xbf16, #tpu.memory_space<vmem>>, %arg3: memref<1x96xf32, #tpu.memory_space<vmem>>, %arg4: memref<32x32xbf16, #tpu.memory_space<vmem>>, %arg5: memref<1x32xf32, #tpu.memory_space<vmem>>, %arg6: memref<1x32xf32, #tpu.memory_space<vmem>>, %arg7: memref<1x32xf32, #tpu.memory_space<vmem>>, %arg8: memref<32x64xbf16, #tpu.memory_space<vmem>>, %arg9: memref<1x64xf32, #tpu.memory_space<vmem>>, %arg10: memref<64x32xbf16, #tpu.memory_space<vmem>>, %arg11: memref<1x32xf32, #tpu.memory_space<vmem>>, %arg12: memref<1x32xf32, #tpu.memory_space<vmem>>, %arg13: memref<1x32xf32, #tpu.memory_space<vmem>>, %arg14: memref<1x8x32xf32, #tpu.memory_space<vmem>>) attributes {dimension_semantics = [#tpu.dimension_semantics<parallel>], iteration_bounds = array<i64: 2>, scalar_prefetch = 0 : i64, scratch_operands = 0 : i64, tpu.core_type = #tpu.core_type<tc>, window_params = [{transform_indices = @transform_0, window_bounds = array<i64: 1, 8, 32>}, {pipeline_mode = #tpu.pipeline_mode<synchronous>, transform_indices = @transform_1, window_bounds = array<i64: 32, 96>}, {pipeline_mode = #tpu.pipeline_mode<synchronous>, transform_indices = @transform_2, window_bounds = array<i64: 1, 96>}, {pipeline_mode = #tpu.pipeline_mode<synchronous>, transform_indices = @transform_3, window_bounds = array<i64: 32, 32>}, {pipeline_mode = #tpu.pipeline_mode<synchronous>, transform_indices = @transform_4, window_bounds = array<i64: 1, 32>}, {pipeline_mode = #tpu.pipeline_mode<synchronous>, transform_indices = @transform_5, window_bounds = array<i64: 1, 32>}, {pipeline_mode = #tpu.pipeline_mode<synchronous>, transform_indices = @transform_6, window_bounds = array<i64: 1, 32>}, {pipeline_mode = #tpu.pipeline_mode<synchronous>, transform_indices = @transform_7, window_bounds = array<i64: 32, 64>}, {pipeline_mode = #tpu.pipeline_mode<synchronous>, transform_indices = @transform_8, window_bounds = array<i64: 1, 64>}, {pipeline_mode = #tpu.pipeline_mode<synchronous>, transform_indices = @transform_9, window_bounds = array<i64: 64, 32>}, {pipeline_mode = #tpu.pipeline_mode<synchronous>, transform_indices = @transform_10, window_bounds = array<i64: 1, 32>}, {pipeline_mode = #tpu.pipeline_mode<synchronous>, transform_indices = @transform_11, window_bounds = array<i64: 1, 32>}, {pipeline_mode = #tpu.pipeline_mode<synchronous>, transform_indices = @transform_12, window_bounds = array<i64: 1, 32>}, {transform_indices = @transform_13, window_bounds = array<i64: 1, 8, 32>}]} {
    %c0 = arith.constant 0 : index
    %c0_0 = arith.constant 0 : index
    %c0_1 = arith.constant 0 : index
    %0 = vector.load %arg1[%c0, %c0_0, %c0_1] : memref<1x8x32xf32, #tpu.memory_space<vmem>>, vector<1x8x32xf32>
    %1 = vector.shape_cast %0 : vector<1x8x32xf32> to vector<8x32xf32>
    %2 = arith.truncf %1 : vector<8x32xf32> to vector<8x32xbf16>
    %c0_2 = arith.constant 0 : index
    %c0_3 = arith.constant 0 : index
    %3 = vector.load %arg2[%c0_2, %c0_3] : memref<32x96xbf16, #tpu.memory_space<vmem>>, vector<32x96xbf16>
    %cst = arith.constant dense<0.000000e+00> : vector<8x96xf32>
    %4 = tpu.matmul %2, %3, %cst {dimension_numbers = #tpu.dot_dimension_numbers<[1], [0], [0], [1], [0, 0, 1, 1], [], []>} : vector<8x32xbf16>, vector<32x96xbf16>, vector<8x96xf32> -> vector<8x96xf32>
    %c0_4 = arith.constant 0 : index
    %c0_5 = arith.constant 0 : index
    %5 = vector.load %arg3[%c0_4, %c0_5] : memref<1x96xf32, #tpu.memory_space<vmem>>, vector<1x96xf32>
    %6 = vector.broadcast %5 : vector<1x96xf32> to vector<8x96xf32>
    %7 = arith.addf %4, %6 : vector<8x96xf32>
    %8 = arith.truncf %7 : vector<8x96xf32> to vector<8x96xbf16>
    %9 = vector.extract_strided_slice %8 {offsets = [0, 0], sizes = [8, 8], strides = [1, 1]} : vector<8x96xbf16> to vector<8x8xbf16>
    %10 = vector.shape_cast %9 : vector<8x8xbf16> to vector<1x8x8xbf16>
    %11 = vector.extract_strided_slice %8 {offsets = [0, 32], sizes = [8, 8], strides = [1, 1]} : vector<8x96xbf16> to vector<8x8xbf16>
    %12 = vector.shape_cast %11 : vector<8x8xbf16> to vector<1x8x8xbf16>
    %13 = vector.extract_strided_slice %8 {offsets = [0, 64], sizes = [8, 8], strides = [1, 1]} : vector<8x96xbf16> to vector<8x8xbf16>
    %14 = vector.shape_cast %13 : vector<8x8xbf16> to vector<1x8x8xbf16>
    "tpu.trace_start"() <{level = 10 : i32, message = "bsd,btd->bst"}> : () -> ()
    %cst_6 = arith.constant dense<0.000000e+00> : vector<1x8x8xf32>
    %15 = tpu.matmul %10, %12, %cst_6 {dimension_numbers = #tpu.dot_dimension_numbers<[2], [2], [1], [1], [0, 0, 0, 1, 1, 1], [0], [0]>} : vector<1x8x8xbf16>, vector<1x8x8xbf16>, vector<1x8x8xf32> -> vector<1x8x8xf32>
    "tpu.trace_stop"() : () -> ()
    %cst_7 = arith.constant 0.353553385 : f32
    %16 = vector.broadcast %cst_7 : f32 to vector<1x8x8xf32>
    %17 = arith.mulf %15, %16 : vector<1x8x8xf32>
    %cst_8 = arith.constant dense<0xFF800000> : vector<1x8xf32>
    %18 = vector.multi_reduction <maximumf>, %17, %cst_8 [2] : vector<1x8x8xf32> to vector<1x8xf32>
    %19 = vector.shape_cast %18 : vector<1x8xf32> to vector<1x8x1xf32>
    %20 = vector.broadcast %19 : vector<1x8x1xf32> to vector<1x8x8xf32>
    %21 = arith.subf %17, %20 : vector<1x8x8xf32>
    %22 = math.exp %21 : vector<1x8x8xf32>
    %cst_9 = arith.constant dense<0.000000e+00> : vector<1x8xf32>
    %23 = vector.multi_reduction <add>, %22, %cst_9 [2] : vector<1x8x8xf32> to vector<1x8xf32>
    %24 = vector.shape_cast %23 : vector<1x8xf32> to vector<1x8x1xf32>
    %25 = tpu.reciprocal %24 {approx = true} : vector<1x8x1xf32> -> vector<1x8x1xf32>
    %26 = vector.broadcast %25 : vector<1x8x1xf32> to vector<1x8x8xf32>
    %27 = arith.mulf %22, %26 : vector<1x8x8xf32>
    %28 = arith.truncf %27 : vector<1x8x8xf32> to vector<1x8x8xbf16>
    "tpu.trace_start"() <{level = 10 : i32, message = "bst,btd->bsd"}> : () -> ()
    %cst_10 = arith.constant dense<0.000000e+00> : vector<1x8x8xf32>
    %29 = tpu.matmul %28, %14, %cst_10 {dimension_numbers = #tpu.dot_dimension_numbers<[2], [1], [1], [2], [0, 0, 0, 1, 1, 2], [0], [0]>} : vector<1x8x8xbf16>, vector<1x8x8xbf16>, vector<1x8x8xf32> -> vector<1x8x8xf32>
    "tpu.trace_stop"() : () -> ()
    %30 = arith.truncf %29 : vector<1x8x8xf32> to vector<1x8x8xbf16>
    %31 = vector.extract_strided_slice %8 {offsets = [0, 8], sizes = [8, 8], strides = [1, 1]} : vector<8x96xbf16> to vector<8x8xbf16>
    %32 = vector.shape_cast %31 : vector<8x8xbf16> to vector<1x8x8xbf16>
    %33 = vector.extract_strided_slice %8 {offsets = [0, 40], sizes = [8, 8], strides = [1, 1]} : vector<8x96xbf16> to vector<8x8xbf16>
    %34 = vector.shape_cast %33 : vector<8x8xbf16> to vector<1x8x8xbf16>
    %35 = vector.extract_strided_slice %8 {offsets = [0, 72], sizes = [8, 8], strides = [1, 1]} : vector<8x96xbf16> to vector<8x8xbf16>
    %36 = vector.shape_cast %35 : vector<8x8xbf16> to vector<1x8x8xbf16>
    "tpu.trace_start"() <{level = 10 : i32, message = "bsd,btd->bst"}> : () -> ()
    %cst_11 = arith.constant dense<0.000000e+00> : vector<1x8x8xf32>
    %37 = tpu.matmul %32, %34, %cst_11 {dimension_numbers = #tpu.dot_dimension_numbers<[2], [2], [1], [1], [0, 0, 0, 1, 1, 1], [0], [0]>} : vector<1x8x8xbf16>, vector<1x8x8xbf16>, vector<1x8x8xf32> -> vector<1x8x8xf32>
    "tpu.trace_stop"() : () -> ()
    %cst_12 = arith.constant 0.353553385 : f32
    %38 = vector.broadcast %cst_12 : f32 to vector<1x8x8xf32>
    %39 = arith.mulf %37, %38 : vector<1x8x8xf32>
    %cst_13 = arith.constant dense<0xFF800000> : vector<1x8xf32>
    %40 = vector.multi_reduction <maximumf>, %39, %cst_13 [2] : vector<1x8x8xf32> to vector<1x8xf32>
    %41 = vector.shape_cast %40 : vector<1x8xf32> to vector<1x8x1xf32>
    %42 = vector.broadcast %41 : vector<1x8x1xf32> to vector<1x8x8xf32>
    %43 = arith.subf %39, %42 : vector<1x8x8xf32>
    %44 = math.exp %43 : vector<1x8x8xf32>
    %cst_14 = arith.constant dense<0.000000e+00> : vector<1x8xf32>
    %45 = vector.multi_reduction <add>, %44, %cst_14 [2] : vector<1x8x8xf32> to vector<1x8xf32>
    %46 = vector.shape_cast %45 : vector<1x8xf32> to vector<1x8x1xf32>
    %47 = tpu.reciprocal %46 {approx = true} : vector<1x8x1xf32> -> vector<1x8x1xf32>
    %48 = vector.broadcast %47 : vector<1x8x1xf32> to vector<1x8x8xf32>
    %49 = arith.mulf %44, %48 : vector<1x8x8xf32>
    %50 = arith.truncf %49 : vector<1x8x8xf32> to vector<1x8x8xbf16>
    "tpu.trace_start"() <{level = 10 : i32, message = "bst,btd->bsd"}> : () -> ()
    %cst_15 = arith.constant dense<0.000000e+00> : vector<1x8x8xf32>
    %51 = tpu.matmul %50, %36, %cst_15 {dimension_numbers = #tpu.dot_dimension_numbers<[2], [1], [1], [2], [0, 0, 0, 1, 1, 2], [0], [0]>} : vector<1x8x8xbf16>, vector<1x8x8xbf16>, vector<1x8x8xf32> -> vector<1x8x8xf32>
    "tpu.trace_stop"() : () -> ()
    %52 = arith.truncf %51 : vector<1x8x8xf32> to vector<1x8x8xbf16>
    %53 = vector.extract_strided_slice %8 {offsets = [0, 16], sizes = [8, 8], strides = [1, 1]} : vector<8x96xbf16> to vector<8x8xbf16>
    %54 = vector.shape_cast %53 : vector<8x8xbf16> to vector<1x8x8xbf16>
    %55 = vector.extract_strided_slice %8 {offsets = [0, 48], sizes = [8, 8], strides = [1, 1]} : vector<8x96xbf16> to vector<8x8xbf16>
    %56 = vector.shape_cast %55 : vector<8x8xbf16> to vector<1x8x8xbf16>
    %57 = vector.extract_strided_slice %8 {offsets = [0, 80], sizes = [8, 8], strides = [1, 1]} : vector<8x96xbf16> to vector<8x8xbf16>
    %58 = vector.shape_cast %57 : vector<8x8xbf16> to vector<1x8x8xbf16>
    "tpu.trace_start"() <{level = 10 : i32, message = "bsd,btd->bst"}> : () -> ()
    %cst_16 = arith.constant dense<0.000000e+00> : vector<1x8x8xf32>
    %59 = tpu.matmul %54, %56, %cst_16 {dimension_numbers = #tpu.dot_dimension_numbers<[2], [2], [1], [1], [0, 0, 0, 1, 1, 1], [0], [0]>} : vector<1x8x8xbf16>, vector<1x8x8xbf16>, vector<1x8x8xf32> -> vector<1x8x8xf32>
    "tpu.trace_stop"() : () -> ()
    %cst_17 = arith.constant 0.353553385 : f32
    %60 = vector.broadcast %cst_17 : f32 to vector<1x8x8xf32>
    %61 = arith.mulf %59, %60 : vector<1x8x8xf32>
    %cst_18 = arith.constant dense<0xFF800000> : vector<1x8xf32>
    %62 = vector.multi_reduction <maximumf>, %61, %cst_18 [2] : vector<1x8x8xf32> to vector<1x8xf32>
    %63 = vector.shape_cast %62 : vector<1x8xf32> to vector<1x8x1xf32>
    %64 = vector.broadcast %63 : vector<1x8x1xf32> to vector<1x8x8xf32>
    %65 = arith.subf %61, %64 : vector<1x8x8xf32>
    %66 = math.exp %65 : vector<1x8x8xf32>
    %cst_19 = arith.constant dense<0.000000e+00> : vector<1x8xf32>
    %67 = vector.multi_reduction <add>, %66, %cst_19 [2] : vector<1x8x8xf32> to vector<1x8xf32>
    %68 = vector.shape_cast %67 : vector<1x8xf32> to vector<1x8x1xf32>
    %69 = tpu.reciprocal %68 {approx = true} : vector<1x8x1xf32> -> vector<1x8x1xf32>
    %70 = vector.broadcast %69 : vector<1x8x1xf32> to vector<1x8x8xf32>
    %71 = arith.mulf %66, %70 : vector<1x8x8xf32>
    %72 = arith.truncf %71 : vector<1x8x8xf32> to vector<1x8x8xbf16>
    "tpu.trace_start"() <{level = 10 : i32, message = "bst,btd->bsd"}> : () -> ()
    %cst_20 = arith.constant dense<0.000000e+00> : vector<1x8x8xf32>
    %73 = tpu.matmul %72, %58, %cst_20 {dimension_numbers = #tpu.dot_dimension_numbers<[2], [1], [1], [2], [0, 0, 0, 1, 1, 2], [0], [0]>} : vector<1x8x8xbf16>, vector<1x8x8xbf16>, vector<1x8x8xf32> -> vector<1x8x8xf32>
    "tpu.trace_stop"() : () -> ()
    %74 = arith.truncf %73 : vector<1x8x8xf32> to vector<1x8x8xbf16>
    %75 = vector.extract_strided_slice %8 {offsets = [0, 24], sizes = [8, 8], strides = [1, 1]} : vector<8x96xbf16> to vector<8x8xbf16>
    %76 = vector.shape_cast %75 : vector<8x8xbf16> to vector<1x8x8xbf16>
    %77 = vector.extract_strided_slice %8 {offsets = [0, 56], sizes = [8, 8], strides = [1, 1]} : vector<8x96xbf16> to vector<8x8xbf16>
    %78 = vector.shape_cast %77 : vector<8x8xbf16> to vector<1x8x8xbf16>
    %79 = vector.extract_strided_slice %8 {offsets = [0, 88], sizes = [8, 8], strides = [1, 1]} : vector<8x96xbf16> to vector<8x8xbf16>
    %80 = vector.shape_cast %79 : vector<8x8xbf16> to vector<1x8x8xbf16>
    "tpu.trace_start"() <{level = 10 : i32, message = "bsd,btd->bst"}> : () -> ()
    %cst_21 = arith.constant dense<0.000000e+00> : vector<1x8x8xf32>
    %81 = tpu.matmul %76, %78, %cst_21 {dimension_numbers = #tpu.dot_dimension_numbers<[2], [2], [1], [1], [0, 0, 0, 1, 1, 1], [0], [0]>} : vector<1x8x8xbf16>, vector<1x8x8xbf16>, vector<1x8x8xf32> -> vector<1x8x8xf32>
    "tpu.trace_stop"() : () -> ()
    %cst_22 = arith.constant 0.353553385 : f32
    %82 = vector.broadcast %cst_22 : f32 to vector<1x8x8xf32>
    %83 = arith.mulf %81, %82 : vector<1x8x8xf32>
    %cst_23 = arith.constant dense<0xFF800000> : vector<1x8xf32>
    %84 = vector.multi_reduction <maximumf>, %83, %cst_23 [2] : vector<1x8x8xf32> to vector<1x8xf32>
    %85 = vector.shape_cast %84 : vector<1x8xf32> to vector<1x8x1xf32>
    %86 = vector.broadcast %85 : vector<1x8x1xf32> to vector<1x8x8xf32>
    %87 = arith.subf %83, %86 : vector<1x8x8xf32>
    %88 = math.exp %87 : vector<1x8x8xf32>
    %cst_24 = arith.constant dense<0.000000e+00> : vector<1x8xf32>
    %89 = vector.multi_reduction <add>, %88, %cst_24 [2] : vector<1x8x8xf32> to vector<1x8xf32>
    %90 = vector.shape_cast %89 : vector<1x8xf32> to vector<1x8x1xf32>
    %91 = tpu.reciprocal %90 {approx = true} : vector<1x8x1xf32> -> vector<1x8x1xf32>
    %92 = vector.broadcast %91 : vector<1x8x1xf32> to vector<1x8x8xf32>
    %93 = arith.mulf %88, %92 : vector<1x8x8xf32>
    %94 = arith.truncf %93 : vector<1x8x8xf32> to vector<1x8x8xbf16>
    "tpu.trace_start"() <{level = 10 : i32, message = "bst,btd->bsd"}> : () -> ()
    %cst_25 = arith.constant dense<0.000000e+00> : vector<1x8x8xf32>
    %95 = tpu.matmul %94, %80, %cst_25 {dimension_numbers = #tpu.dot_dimension_numbers<[2], [1], [1], [2], [0, 0, 0, 1, 1, 2], [0], [0]>} : vector<1x8x8xbf16>, vector<1x8x8xbf16>, vector<1x8x8xf32> -> vector<1x8x8xf32>
    "tpu.trace_stop"() : () -> ()
    %96 = arith.truncf %95 : vector<1x8x8xf32> to vector<1x8x8xbf16>
    %97 = tpu.concatenate %30, %52, %74, %96 in 2 : vector<1x8x8xbf16>, vector<1x8x8xbf16>, vector<1x8x8xbf16>, vector<1x8x8xbf16> -> vector<1x8x32xbf16>
    %98 = vector.shape_cast %97 : vector<1x8x32xbf16> to vector<8x32xbf16>
    %c0_26 = arith.constant 0 : index
    %c0_27 = arith.constant 0 : index
    %99 = vector.load %arg4[%c0_26, %c0_27] : memref<32x32xbf16, #tpu.memory_space<vmem>>, vector<32x32xbf16>
    %cst_28 = arith.constant dense<0.000000e+00> : vector<8x32xf32>
    %100 = tpu.matmul %98, %99, %cst_28 {dimension_numbers = #tpu.dot_dimension_numbers<[1], [0], [0], [1], [0, 0, 1, 1], [], []>} : vector<8x32xbf16>, vector<32x32xbf16>, vector<8x32xf32> -> vector<8x32xf32>
    %c0_29 = arith.constant 0 : index
    %c0_30 = arith.constant 0 : index
    %101 = vector.load %arg5[%c0_29, %c0_30] : memref<1x32xf32, #tpu.memory_space<vmem>>, vector<1x32xf32>
    %102 = vector.broadcast %101 : vector<1x32xf32> to vector<8x32xf32>
    %103 = arith.addf %100, %102 : vector<8x32xf32>
    %104 = arith.addf %1, %103 : vector<8x32xf32>
    %cst_31 = arith.constant dense<0.000000e+00> : vector<8xf32>
    %105 = vector.multi_reduction <add>, %104, %cst_31 [1] : vector<8x32xf32> to vector<8xf32>
    %106 = vector.shape_cast %105 : vector<8xf32> to vector<8x1xf32>
    %cst_32 = arith.constant 3.200000e+01 : f32
    %107 = vector.broadcast %cst_32 : f32 to vector<8x1xf32>
    %108 = arith.divf %106, %107 : vector<8x1xf32>
    %109 = vector.broadcast %108 : vector<8x1xf32> to vector<8x32xf32>
    %110 = arith.subf %104, %109 : vector<8x32xf32>
    %111 = arith.mulf %110, %110 : vector<8x32xf32>
    %cst_33 = arith.constant dense<0.000000e+00> : vector<8xf32>
    %112 = vector.multi_reduction <add>, %111, %cst_33 [1] : vector<8x32xf32> to vector<8xf32>
    %113 = vector.shape_cast %112 : vector<8xf32> to vector<8x1xf32>
    %cst_34 = arith.constant 3.200000e+01 : f32
    %114 = vector.broadcast %cst_34 : f32 to vector<8x1xf32>
    %115 = arith.divf %113, %114 : vector<8x1xf32>
    %116 = vector.broadcast %108 : vector<8x1xf32> to vector<8x32xf32>
    %117 = arith.subf %104, %116 : vector<8x32xf32>
    %cst_35 = arith.constant 9.99999974E-6 : f32
    %118 = vector.broadcast %cst_35 : f32 to vector<8x1xf32>
    %119 = arith.addf %115, %118 : vector<8x1xf32>
    %120 = math.rsqrt %119 : vector<8x1xf32>
    %121 = vector.broadcast %120 : vector<8x1xf32> to vector<8x32xf32>
    %122 = arith.mulf %117, %121 : vector<8x32xf32>
    %c0_36 = arith.constant 0 : index
    %c0_37 = arith.constant 0 : index
    %123 = vector.load %arg6[%c0_36, %c0_37] : memref<1x32xf32, #tpu.memory_space<vmem>>, vector<1x32xf32>
    %124 = vector.broadcast %123 : vector<1x32xf32> to vector<8x32xf32>
    %125 = arith.mulf %122, %124 : vector<8x32xf32>
    %c0_38 = arith.constant 0 : index
    %c0_39 = arith.constant 0 : index
    %126 = vector.load %arg7[%c0_38, %c0_39] : memref<1x32xf32, #tpu.memory_space<vmem>>, vector<1x32xf32>
    %127 = vector.broadcast %126 : vector<1x32xf32> to vector<8x32xf32>
    %128 = arith.addf %125, %127 : vector<8x32xf32>
    %129 = arith.truncf %128 : vector<8x32xf32> to vector<8x32xbf16>
    %c0_40 = arith.constant 0 : index
    %c0_41 = arith.constant 0 : index
    %130 = vector.load %arg8[%c0_40, %c0_41] : memref<32x64xbf16, #tpu.memory_space<vmem>>, vector<32x64xbf16>
    %cst_42 = arith.constant dense<0.000000e+00> : vector<8x64xf32>
    %131 = tpu.matmul %129, %130, %cst_42 {dimension_numbers = #tpu.dot_dimension_numbers<[1], [0], [0], [1], [0, 0, 1, 1], [], []>} : vector<8x32xbf16>, vector<32x64xbf16>, vector<8x64xf32> -> vector<8x64xf32>
    %c0_43 = arith.constant 0 : index
    %c0_44 = arith.constant 0 : index
    %132 = vector.load %arg9[%c0_43, %c0_44] : memref<1x64xf32, #tpu.memory_space<vmem>>, vector<1x64xf32>
    %133 = vector.broadcast %132 : vector<1x64xf32> to vector<8x64xf32>
    %134 = arith.addf %131, %133 : vector<8x64xf32>
    %cst_45 = arith.constant 0.000000e+00 : f32
    %135 = vector.broadcast %cst_45 : f32 to vector<8x64xf32>
    %136 = arith.maximumf %134, %135 : vector<8x64xf32>
    %137 = arith.truncf %136 : vector<8x64xf32> to vector<8x64xbf16>
    %c0_46 = arith.constant 0 : index
    %c0_47 = arith.constant 0 : index
    %138 = vector.load %arg10[%c0_46, %c0_47] : memref<64x32xbf16, #tpu.memory_space<vmem>>, vector<64x32xbf16>
    %cst_48 = arith.constant dense<0.000000e+00> : vector<8x32xf32>
    %139 = tpu.matmul %137, %138, %cst_48 {dimension_numbers = #tpu.dot_dimension_numbers<[1], [0], [0], [1], [0, 0, 1, 1], [], []>} : vector<8x64xbf16>, vector<64x32xbf16>, vector<8x32xf32> -> vector<8x32xf32>
    %c0_49 = arith.constant 0 : index
    %c0_50 = arith.constant 0 : index
    %140 = vector.load %arg11[%c0_49, %c0_50] : memref<1x32xf32, #tpu.memory_space<vmem>>, vector<1x32xf32>
    %141 = vector.broadcast %140 : vector<1x32xf32> to vector<8x32xf32>
    %142 = arith.addf %139, %141 : vector<8x32xf32>
    %143 = arith.addf %128, %142 : vector<8x32xf32>
    %cst_51 = arith.constant dense<0.000000e+00> : vector<8xf32>
    %144 = vector.multi_reduction <add>, %143, %cst_51 [1] : vector<8x32xf32> to vector<8xf32>
    %145 = vector.shape_cast %144 : vector<8xf32> to vector<8x1xf32>
    %cst_52 = arith.constant 3.200000e+01 : f32
    %146 = vector.broadcast %cst_52 : f32 to vector<8x1xf32>
    %147 = arith.divf %145, %146 : vector<8x1xf32>
    %148 = vector.broadcast %147 : vector<8x1xf32> to vector<8x32xf32>
    %149 = arith.subf %143, %148 : vector<8x32xf32>
    %150 = arith.mulf %149, %149 : vector<8x32xf32>
    %cst_53 = arith.constant dense<0.000000e+00> : vector<8xf32>
    %151 = vector.multi_reduction <add>, %150, %cst_53 [1] : vector<8x32xf32> to vector<8xf32>
    %152 = vector.shape_cast %151 : vector<8xf32> to vector<8x1xf32>
    %cst_54 = arith.constant 3.200000e+01 : f32
    %153 = vector.broadcast %cst_54 : f32 to vector<8x1xf32>
    %154 = arith.divf %152, %153 : vector<8x1xf32>
    %155 = vector.broadcast %147 : vector<8x1xf32> to vector<8x32xf32>
    %156 = arith.subf %143, %155 : vector<8x32xf32>
    %cst_55 = arith.constant 9.99999974E-6 : f32
    %157 = vector.broadcast %cst_55 : f32 to vector<8x1xf32>
    %158 = arith.addf %154, %157 : vector<8x1xf32>
    %159 = math.rsqrt %158 : vector<8x1xf32>
    %160 = vector.broadcast %159 : vector<8x1xf32> to vector<8x32xf32>
    %161 = arith.mulf %156, %160 : vector<8x32xf32>
    %c0_56 = arith.constant 0 : index
    %c0_57 = arith.constant 0 : index
    %162 = vector.load %arg12[%c0_56, %c0_57] : memref<1x32xf32, #tpu.memory_space<vmem>>, vector<1x32xf32>
    %163 = vector.broadcast %162 : vector<1x32xf32> to vector<8x32xf32>
    %164 = arith.mulf %161, %163 : vector<8x32xf32>
    %c0_58 = arith.constant 0 : index
    %c0_59 = arith.constant 0 : index
    %165 = vector.load %arg13[%c0_58, %c0_59] : memref<1x32xf32, #tpu.memory_space<vmem>>, vector<1x32xf32>
    %166 = vector.broadcast %165 : vector<1x32xf32> to vector<8x32xf32>
    %167 = arith.addf %164, %166 : vector<8x32xf32>
    %168 = vector.shape_cast %167 : vector<8x32xf32> to vector<1x8x32xf32>
    %c0_60 = arith.constant 0 : index
    %c0_61 = arith.constant 0 : index
    %c0_62 = arith.constant 0 : index
    %169 = vector.load %arg14[%c0_60, %c0_61, %c0_62] : memref<1x8x32xf32, #tpu.memory_space<vmem>>, vector<1x8x32xf32>
    tpu.vector_store %arg14[%c0_60, %c0_61, %c0_62], %168 {strides = array<i32>} : memref<1x8x32xf32, #tpu.memory_space<vmem>>, vector<1x8x32xf32>,
    return
  }
  func.func @transform_0(%arg0: i32) -> (i32, i32, i32) {
    %c0_i32 = arith.constant 0 : i32
    %c0_i32_0 = arith.constant 0 : i32
    %c0_i32_1 = arith.constant 0 : i32
    return %arg0, %c0_i32, %c0_i32_0 : i32, i32, i32
  }
  func.func @transform_1(%arg0: i32) -> (i32, i32) {
    %c0_i32 = arith.constant 0 : i32
    %c0_i32_0 = arith.constant 0 : i32
    %c0_i32_1 = arith.constant 0 : i32
    return %c0_i32, %c0_i32_0 : i32, i32
  }
  func.func @transform_2(%arg0: i32) -> (i32, i32) {
    %c0_i32 = arith.constant 0 : i32
    %c0_i32_0 = arith.constant 0 : i32
    %c0_i32_1 = arith.constant 0 : i32
    return %c0_i32, %c0_i32_0 : i32, i32
  }
  func.func @transform_3(%arg0: i32) -> (i32, i32) {
    %c0_i32 = arith.constant 0 : i32
    %c0_i32_0 = arith.constant 0 : i32
    %c0_i32_1 = arith.constant 0 : i32
    return %c0_i32, %c0_i32_0 : i32, i32
  }
  func.func @transform_4(%arg0: i32) -> (i32, i32) {
    %c0_i32 = arith.constant 0 : i32
    %c0_i32_0 = arith.constant 0 : i32
    %c0_i32_1 = arith.constant 0 : i32
    return %c0_i32, %c0_i32_0 : i32, i32
  }
  func.func @transform_5(%arg0: i32) -> (i32, i32) {
    %c0_i32 = arith.constant 0 : i32
    %c0_i32_0 = arith.constant 0 : i32
    %c0_i32_1 = arith.constant 0 : i32
    return %c0_i32, %c0_i32_0 : i32, i32
  }
  func.func @transform_6(%arg0: i32) -> (i32, i32) {
    %c0_i32 = arith.constant 0 : i32
    %c0_i32_0 = arith.constant 0 : i32
    %c0_i32_1 = arith.constant 0 : i32
    return %c0_i32, %c0_i32_0 : i32, i32
  }
  func.func @transform_7(%arg0: i32) -> (i32, i32) {
    %c0_i32 = arith.constant 0 : i32
    %c0_i32_0 = arith.constant 0 : i32
    %c0_i32_1 = arith.constant 0 : i32
    return %c0_i32, %c0_i32_0 : i32, i32
  }
  func.func @transform_8(%arg0: i32) -> (i32, i32) {
    %c0_i32 = arith.constant 0 : i32
    %c0_i32_0 = arith.constant 0 : i32
    %c0_i32_1 = arith.constant 0 : i32
    return %c0_i32, %c0_i32_0 : i32, i32
  }
  func.func @transform_9(%arg0: i32) -> (i32, i32) {
    %c0_i32 = arith.constant 0 : i32
    %c0_i32_0 = arith.constant 0 : i32
    %c0_i32_1 = arith.constant 0 : i32
    return %c0_i32, %c0_i32_0 : i32, i32
  }
  func.func @transform_10(%arg0: i32) -> (i32, i32) {
    %c0_i32 = arith.constant 0 : i32
    %c0_i32_0 = arith.constant 0 : i32
    %c0_i32_1 = arith.constant 0 : i32
    return %c0_i32, %c0_i32_0 : i32, i32
  }
  func.func @transform_11(%arg0: i32) -> (i32, i32) {
    %c0_i32 = arith.constant 0 : i32
    %c0_i32_0 = arith.constant 0 : i32
    %c0_i32_1 = arith.constant 0 : i32
    return %c0_i32, %c0_i32_0 : i32, i32
  }
  func.func @transform_12(%arg0: i32) -> (i32, i32) {
    %c0_i32 = arith.constant 0 : i32
    %c0_i32_0 = arith.constant 0 : i32
    %c0_i32_1 = arith.constant 0 : i32
    return %c0_i32, %c0_i32_0 : i32, i32
  }
  func.func @transform_13(%arg0: i32) -> (i32, i32, i32) {
    %c0_i32 = arith.constant 0 : i32
    %c0_i32_0 = arith.constant 0 : i32
    %c0_i32_1 = arith.constant 0 : i32
    return %arg0, %c0_i32, %c0_i32_0 : i32, i32, i32
  }
}

</mosaic_0001>

<bundles_post_ra>
// kernel: tpu_custom_call.1
= control target key start
LH: loop header
LB: loop body
LE: loop exit
PB: predicated region body
PF: predicated region fallthrough
CT: control target
= control target key end

     0   :  { %s1592_s0 = inlined_call_operand.vmem [shape: f32[2,8,32], index: 0, kind: input, shape index: {}]   ;;  %s1593_s1 = inlined_call_operand.vmem [shape: bf16[32,96], index: 1, kind: input, shape index: {}]   ;;  %s1594_s2 = inlined_call_operand.vmem [shape: f32[1,96], index: 2, kind: input, shape index: {}]   ;;  %s1595_s3 = inlined_call_operand.vmem [shape: bf16[32,32], index: 3, kind: input, shape index: {}]   ;;  %s1596_s4 = inlined_call_operand.vmem [shape: f32[1,32], index: 4, kind: input, shape index: {}]   ;;  %s1597_s5 = inlined_call_operand.vmem [shape: f32[1,32], index: 5, kind: input, shape index: {}]   ;;  %s1598_s6 = inlined_call_operand.vmem [shape: f32[1,32], index: 6, kind: input, shape index: {}]   ;;  %s1599_s7 = inlined_call_operand.hbm [shape: bf16[32,64], index: 7, kind: input, shape index: {}]   ;;  %s1600_s8 = inlined_call_operand.vmem [shape: f32[1,64], index: 8, kind: input, shape index: {}]   ;;  %s1601_s9 = inlined_call_operand.vmem [shape: bf16[64,32], index: 9, kind: input, shape index: {}]   ;;  %s1602_s10 = inlined_call_operand.vmem [shape: f32[1,32], index: 10, kind: input, shape index: {}]   ;;  %s1603_s11 = inlined_call_operand.vmem [shape: f32[1,32], index: 11, kind: input, shape index: {}]   ;;  %s1604_s12 = inlined_call_operand.vmem [shape: f32[1,32], index: 12, kind: input, shape index: {}]   ;;  %s1605_s13 = inlined_call_operand.hbm [shape: f32[2,8,32], index: 13, kind: output, shape index: {}]  }
   0x1   :  { %1607 = sst [smem:[#allocation10_spill]] %s1592_s0 }
   0x2   :  { %1608 = sst [smem:[#allocation11_spill]] %s1599_s7 }
   0x3   :  { %18 = vsyncpa [#allocation3], 0 }
   0x4   :  { %19 = vsyncpa [#allocation4], 0 }
   0x5   :  { %21 = vsyncpa [#allocation4 + $0x1], 0  ;;  %s1398_s25 = smov 0   ;;  %s1400_s26 = smov 0  }
   0x6   :  { %s1402_s27 = smov 0   ;;  %s1404_s28 = smov 0  }
   0x7 LB: > { %1609 = sst [smem:[#allocation8_spill]] %s1304_s27  ;;  %s1419_s29 = sadd.s32 4294967295, %s1308_s28   ;;  %s1308_s28 = sphi %s1404_s28, %s1619_s28   ;;  %s1304_s27 = sphi %s1402_s27, %s1616_s27   ;;  %s1300_s26 = sphi %s1400_s26, %s1618_s26   ;;  %s1296_s25 = sphi %s1398_s25, %s1617_s25  }
   0x8   : > { %s1041_s30 = sadd.s32 4294967294, %s1308_s28   ;;  %s1423_s14 = sadd.s32 1, %s1308_s28  }
   0x9   : > { %s312_s15 = sadd.s32 1, %s1304_s27  ;;  %s309_s16 = ssub.s32 %s1308_s28, %s1423_s14 }
   0xa   : > { %p322_p0 = scmp.ne.s32.totalorder %s1304_s27, %s1300_s26  ;;  %p310_p1 = scmp.eq.s32.totalorder %s309_s16, 0 }
   0xb   : > { %p323_p2 = scmp.eq.s32.totalorder %s1419_s29, 1  ;;  %p328_p3 = scmp.ne.s32.totalorder %s1300_s26, %s1296_s25 }
   0xc   : > { %p329_p4 = scmp.eq.s32.totalorder %s1041_s30, 1  ;;  %p1042_p7 = scmp.ge.s32.totalorder %s1308_s28, 1 }
   0xd   : > { %s1434_s17 = scalar_select %p310_p1, %s1304_s27, %s312_s15  }
   0xe   : > { %p1436_p5 = por %p323_p2, %p322_p0  ;;  %p1440_p6 = por %p329_p4, %p328_p3 }
   0xf   : > { %1610 = sst [smem:[#allocation9_spill]] %s1434_s17  ;;  %p336_p8 = scmp.lt.s32.totalorder %s1308_s28, 3 }
  0x10   : > { %p1129_p9 = scmp.eq.s32.totalorder %s1419_s29, 0  ;;  %s1613_s7 = sld [smem:[#allocation11_spill]] }
  0x11   : > { %p337_p10 = pnand %p1042_p7, %p336_p8  ;;  %s1310_s23 = smov [#allocation2]  }
  0x12   : > { %s367_s24 = sshll.u32 %s1310_s23, 4  ;;  %s1311_s30 = smov 64   ;;  %s368_s24 = int_to_ptr.vmem [resolvable:$true] %s367_s24 }
  0x13   : > { %p1121_p11 = pneg %p337_p10  ;;  %s1312_s15 = smov 4  }
  0x14   : > { %405 = sbr.rel (%p337_p10) target bundleno = 1917 (0x77d), region = 72 }
  0x15   : > { %p1122_p12 = pnand %p1129_p9, %p1121_p11 }
  0x16   : > { %s365_s22 = sshll.u32 %s1613_s7, 4  ;;  %s366_s22 = int_to_ptr.hbm [resolvable:$true] %s365_s22 }
  0x17   : > { %1124 = dma.hbm_to_vmem [thread:$0]  (!%p1122_p12), %s366_s22, 256, %s368_s24, [#allocation3], %s1311_s30, %s1311_s30, %s1312_s15  }
  0x19   : > { %1287 = dma.done.wait (%p1129_p9), [#allocation3], 256  }
  0x1a   : > { %1289 = vsyncadd (%p1129_p9), [#allocation3], 4294967040  ;;  %p449_p13 = scmp.lt.s32.totalorder %s1419_s29, 1  ;;  %s1614_s0 = sld [smem:[#allocation10_spill]]  ;;  %v1106_v0 = vld [vmem:[%s1593_s1 + $0x8] sm:$0xff]  ;;  %v1105_v1 = vld [vmem:[%s1593_s1] sm:$0xff] }
  0x1b   : > { %486 = vmatpush.bf16.msra.mxu0 %v1106_v0  ;;  %vm476_vm0 = vcmask 261120   ;;  %v1182_v4 = vld [vmem:[%s1594_s2] ss:$0 sm:$0xff]  ;;  %s1314_s27 = smov 120   ;;  %s1315_s17 = smov 96   ;;  %vm499_vm1 = vcmask 64512  }
  0x1c   : > { %s450_s16 = scalar_select %p449_p13, %s1419_s29, 1  ;;  %vm537_vm2 = vcmask 1043456   ;;  %vm747_vm3 = vcmask 130048   ;;  %vm750_vm4 = vcmask 195584   ;;  %vm903_vm9 = vcmask 523264  }
  0x1d   : > { %s1318_s21 = smov 88   ;;  %s1319_s23 = smov 112  }
  0x1e   : > { %s1048_s20 = sshll.u32 %s450_s16, 3  ;;  %s1316_s16 = smov 80  }
  0x1f   : > { %487 = vmatpush.bf16.msra.mxu0 %v1105_v1  ;;  %s1320_s22 = smov 64   ;;  %s1321_s24 = smov 40  }
  0x20   : > { %s452_s7 = scalar_lea.vmem %s1614_s0, %s1048_s20  ;;  %s1317_s20 = smov 72  }
  0x21   : > { %v1467_v2 = vld [vmem:[%s452_s7] sm:$0xff]  ;;  %s1313_s7 = smov 104   ;;  %s1322_s30 = smov 56  }
  0x22   : > { %v455_v3 = vpack.c.bf16 %v1467_v2, %v1467_v2  ;;  %s1323_s15 = smov 48  }
  0x24   : > { %1057 = vmatmul.msk.bf16.vlgmr.msra.gmra.mxu0 %vm476_vm0, %v455_v3 }
  0xa1   : > { %v489_v5 = vpop.f32.mrf.mxu0 }
  0xa2   : > { %v490_v6 = vadd.f32 %v1182_v4, %v489_v5 }
  0xa4   : > { %v493_v7 = vpack.c.bf16 %v490_v6, %v490_v6 }
  0xa6   : > { %v495_v8 = vunpack.c.l.b16 %v493_v7 }
  0xa8   : > { %v1475_v9 = vpack.c.b16 %v495_v8, %v495_v8 }
  0xa9   : > { %v491_v10 = vpop.f32.mrf.mxu0 }
  0xaa   : > { %671 = vrot.lane.b32.xlu2 %v1475_v9, %s1313_s7  ;;  %555 = vrot.lane.b32.xlu1 %v1475_v9, %s1314_s27  ;;  %s1324_s7 = smov 8   ;;  %s1325_s27 = smov 16  }
  0xab   : > { %497 = vrot.lane.b32.xlu0 %v1475_v9, %s1315_s17  ;;  %s1326_s17 = smov 24  }
  0xb2   : > { %615 = vrot.lane.b32.xlu2 %v1475_v9, %s1316_s16  ;;  %673 = vrot.lane.b32.xlu1 %v1475_v9, %s1317_s20  ;;  %s446_s16 = sand.u32 1, %s1300_s26  }
  0xb3   : > { %557 = vrot.lane.b32.xlu0 %v1475_v9, %s1318_s21  ;;  %s1047_s20 = sshll.u32 %s446_s16, 3  ;;  %s1102_s21 = sshll.u32 %s1419_s29, 3 }
  0xbb   : > { %613 = vrot.lane.b32.xlu0 %v1475_v9, %s1319_s23  ;;  %s955_s23 = scalar_lea.sflag [#allocation4], %s446_s16 }
 0x104   : > { %v672_v11 = vpop.permute.xlu2 %671 }
 0x10c   : > { %v616_v12 = vpop.permute.xlu2 %615 }
 0x10d   : > { %v621_v13 = vsel %vm499_vm1, %v616_v12, 0 }
 0x10e   : > { %630 = vmatpush.bf16.xpose.msrb.mxu0 %v621_v13 }
 0x11c   : > { %v556_v14 = vpop.permute.xlu1 %555 }
 0x11d   : > { %v498_v15 = vpop.permute.xlu0 %497 }
 0x11e   : > { %v504_v16 = vsel %vm499_vm1, %v498_v15, 0 }
 0x11f   : > { %513 = vmatpush.bf16.xpose.msra.mxu1 %v504_v16 }
 0x124   : > { %v674_v17 = vpop.permute.xlu1 %673 }
 0x125   : > { %v558_v18 = vpop.permute.xlu0 %557  ;;  %v679_v19 = vsel %vm499_vm1, %v674_v17, 0 }
 0x126   : > { %1058 = vmatmul.msk.bf16.vlgmr.msra.gmra.mxu1 %vm499_vm1, %v493_v7  ;;  %v563_v20 = vsel %vm499_vm1, %v558_v18, 0 }
 0x127   : > { %572 = vmatpush.bf16.xpose.msra.mxu3 %v563_v20 }
 0x12d   : > { %v614_v21 = vpop.permute.xlu0 %613 }
 0x12e   : > { %1060 = vmatmul.msk.bf16.vlgmr.msra.gmra.mxu3 %vm499_vm1, %v556_v14  ;;  %1062 = vmatmul.msk.bf16.vlgmr.msrb.gmra.mxu0 %vm499_vm1, %v614_v21 }
 0x12f   : > { %688 = vmatpush.bf16.xpose.msrb.mxu3 %v679_v19 }
 0x13e   : > { %1064 = vmatmul.msk.bf16.vlgmr.msrb.gmra.mxu3 %vm499_vm1, %v672_v11 }
 0x1a3   : > { %v515_v22 = vpop.f32.mrf.mxu1 }
 0x1a4   : > { %v519_v23 = vmul.f32 0.35355338, %v515_v22 }
 0x1a6   : > { %v520_v24 = vsel %vm499_vm1, %v519_v23, -inf }
 0x1a7   : > { %521 = vmax.xlane.f32.xlu1 %v520_v24 }
 0x1ab   : > { %v517_v25 = vpop.f32.mrf.mxu1  ;;  %v632_v26 = vpop.f32.mrf.mxu0 }
 0x1ac   : > { %v636_v31 = vmul.f32 0.35355338, %v632_v26 }
 0x1ae   : > { %v637_v33 = vsel %vm499_vm1, %v636_v31, -inf }
 0x1b1   : > { %v574_v27 = vpop.f32.mrf.mxu3 }
 0x1b2   : > { %v578_v28 = vmul.f32 0.35355338, %v574_v27 }
 0x1b3   : > { %v634_v29 = vpop.f32.mrf.mxu0 }
 0x1b4   : > { %v579_v30 = vsel %vm499_vm1, %v578_v28, -inf }
 0x1b5   : > { %580 = vmax.xlane.f32.xlu2 %v579_v30 }
 0x1b9   : > { %v576_v32 = vpop.f32.mrf.mxu3 }
 0x1bd   : > { %638 = vmax.xlane.f32.xlu2 %v637_v33 }
 0x1c1   : > { %v690_v34 = vpop.f32.mrf.mxu3 }
 0x1c2   : > { %v694_v35 = vmul.f32 0.35355338, %v690_v34 }
 0x1c4   : > { %v695_v36 = vsel %vm499_vm1, %v694_v35, -inf }
 0x1c5   : > { %696 = vmax.xlane.f32.xlu0 %v695_v36  ;;  %v1108_v36 = vld [vmem:[%s1595_s3 + $0x8] sm:$0xff] }
 0x1c6   : > { %781 = vmatpush.bf16.msra.mxu0 %v1108_v36 }
 0x1c9   : > { %v692_v37 = vpop.f32.mrf.mxu3 }
 0x1ca   : > { %v1107_v37 = vld [vmem:[%s1595_s3] sm:$0xff] }
 0x1cb   : > { %782 = vmatpush.bf16.msra.mxu0 %v1107_v37 }
 0x1d5   : > { %532 = vrot.lane.b32.xlu2 %v1475_v9, %s1320_s22 }
 0x1dd   : > { %707 = vrot.lane.b32.xlu2 %v1475_v9, %s1321_s24 }
 0x21a   : > { %v522_v38 = vpop.xlane.xlu1 %521 }
 0x21b   : > { %v523_v39 = vsub.f32 %v519_v23, %v522_v38 }
 0x21d   : > { %v524_v40 = vmul.f32 1.442695, %v523_v39 }
 0x21f   : > { %1190 = vpow2.f32 %v524_v40 }
 0x225   : > { %v1191_v41 = vpop.eup %1190 }
 0x226   : > { %v526_v42 = vsel %vm499_vm1, %v1191_v41, 0.0 }
 0x227   : > { %527 = vadd.xlane.f32.xlu1 %v526_v42 }
 0x228   : > { %v581_v43 = vpop.xlane.xlu2 %580 }
 0x229   : > { %v582_v46 = vsub.f32 %v578_v28, %v581_v43 }
 0x22b   : > { %v583_v48 = vmul.f32 1.442695, %v582_v46 }
 0x230   : > { %v639_v44 = vpop.xlane.xlu2 %638 }
 0x231   : > { %v640_v45 = vsub.f32 %v636_v31, %v639_v44 }
 0x233   : > { %v641_v47 = vmul.f32 1.442695, %v640_v45  ;;  %v1183_v45 = vld [vmem:[%s1596_s4] ss:$0 sm:$0xff] }
 0x235   : > { %1192 = vpow2.f32 %v641_v47 }
 0x236   : > { %1194 = vpow2.f32 %v583_v48 }
 0x238   : > { %v533_v49 = vpop.permute.xlu2 %532  ;;  %v697_v50 = vpop.xlane.xlu0 %696 }
 0x239   : > { %v539_v51 = vsel %vm537_vm2, %v533_v49, 0  ;;  %v698_v53 = vsub.f32 %v694_v35, %v697_v50 }
 0x23a   : > { %548 = vmatpush.bf16.msra.mxu2 %v539_v51  ;;  %v1327_v51 = vmov 32.0  }
 0x23b   : > { %v1193_v52 = vpop.eup %1192  ;;  %v699_v55 = vmul.f32 1.442695, %v698_v53 }
 0x23c   : > { %v643_v54 = vsel %vm499_vm1, %v1193_v52, 0.0  ;;  %v1195_v56 = vpop.eup %1194 }
 0x23d   : > { %644 = vadd.xlane.f32.xlu0 %v643_v54  ;;  %1196 = vpow2.f32 %v699_v55  ;;  %v585_v57 = vsel %vm499_vm1, %v1195_v56, 0.0 }
 0x240   : > { %591 = vrot.lane.b32.xlu1 %v1475_v9, %s1322_s30  ;;  %v708_v1 = vpop.permute.xlu2 %707 }
 0x241   : > { %v713_v5 = vsel %vm537_vm2, %v708_v1, 0 }
 0x243   : > { %v1197_v58 = vpop.eup %1196 }
 0x244   : > { %v701_v59 = vsel %vm499_vm1, %v1197_v58, 0.0 }
 0x245   : > { %586 = vadd.xlane.f32.xlu0 %v585_v57 }
 0x24d   : > { %702 = vadd.xlane.f32.xlu0 %v701_v59 }
 0x261   : > { %649 = vrot.lane.b32.xlu0 %v1475_v9, %s1323_s15  ;;  %s965_s15 = scalar_lea.hbm %s1605_s13, %s1102_s21 }
 0x262   : > { %s969_s0 = sshll.u32 %s965_s15, 4  ;;  %s970_s0 = int_to_ptr.hbm [resolvable:$true] %s969_s0 }
 0x263   : > { %s1256_s22 = sshra.s32 %s970_s0, 4  ;;  %s1257_s22 = int_to_ptr.hbm [resolvable:$true] %s1256_s22 }
 0x264   : > { %s1258_s21 = scalar_lea.hbm %s1257_s22, 8  ;;  %p1263_p3 = scmp.lt.s32.totalorder %s1257_s22, %s1605_s13 }
 0x265   : > { %p1259_p0 = scmp.ne.s32.totalorder %s1257_s22, %s1258_s21 }
 0x267   : > { %p1260_p1 = pnand %p1259_p0, %p1436_p5 }
 0x269   : > { %p1261_p2 = pneg %p1260_p1 }
 0x29a   : > { %v528_v60 = vpop.xlane.xlu1 %527 }
 0x29b   : > { %1198 = vrcp.f32 %v528_v60 }
 0x2a1   : > { %v1199_v61 = vpop.eup %1198 }
 0x2a2   : > { %v530_v62 = vmul.f32 %v1199_v61, %v1191_v41 }
 0x2a4   : > { %v531_v63 = vpack.c.bf16 %v530_v62, %v530_v62 }
 0x2a6   : > { %1059 = vmatmul.msk.bf16.vlgmr.msra.gmra.mxu2 %vm499_vm1, %v531_v63  ;;  %v1109_v63 = vld [vmem:[#allocation2] sm:$0xff] }
 0x2b0   : > { %v645_v0 = vpop.xlane.xlu0 %644 }
 0x2b2   : > { %v592_v3 = vpop.permute.xlu1 %591 }
 0x2b3   : > { %v597_v4 = vsel %vm537_vm2, %v592_v3, 0 }
 0x2b4   : > { %606 = vmatpush.bf16.msrb.mxu2 %v597_v4  ;;  %v1113_v4 = vld [vmem:[%s1601_s9 + $0x10] sm:$0xff] }
 0x2b8   : > { %722 = vmatpush.bf16.msra.mxu2 %v713_v5  ;;  %v587_v6 = vpop.xlane.xlu0 %586 }
 0x2b9   : > { %1200 = vrcp.f32 %v587_v6  ;;  %v1112_v6 = vld [vmem:[%s1601_s9 + $0x8] sm:$0xff] }
 0x2bf   : > { %v1201_v7 = vpop.eup %1200 }
 0x2c0   : > { %v589_v8 = vmul.f32 %v1201_v7, %v1195_v56  ;;  %v703_v9 = vpop.xlane.xlu0 %702 }
 0x2c1   : > { %1202 = vrcp.f32 %v703_v9 }
 0x2c2   : > { %v590_v10 = vpack.c.bf16 %v589_v8, %v589_v8  ;;  %1204 = vrcp.f32 %v645_v0  ;;  %v1114_v0 = vld [vmem:[%s1601_s9 + $0x18] sm:$0xff] }
 0x2c3   : > { %1206 = vrcp.f32 %v1327_v51  ;;  %911 = vmatpush.bf16.msra.mxu3 %v1114_v0 }
 0x2c4   : > { %1061 = vmatmul.msk.bf16.vlgmr.msrb.gmra.mxu2 %vm499_vm1, %v590_v10 }
 0x2c7   : > { %v1203_v11 = vpop.eup %1202  ;;  %912 = vmatpush.bf16.msra.mxu3 %v1113_v4 }
 0x2c8   : > { %v705_v12 = vmul.f32 %v1203_v11, %v1197_v58  ;;  %v1205_v13 = vpop.eup %1204 }
 0x2c9   : > { %v647_v14 = vmul.f32 %v1205_v13, %v1193_v52  ;;  %v1207_v52 = vpop.eup %1206  ;;  %v1184_v13 = vld [vmem:[%s1597_s5] ss:$0 sm:$0xff] }
 0x2ca   : > { %v706_v15 = vpack.c.bf16 %v705_v12, %v705_v12  ;;  %v793_v53 = vmul.f32 32.0, %v1207_v52  ;;  %vm797_vm5 = vweird.f32 %v1207_v52 }
 0x2cb   : > { %v648_v18 = vpack.c.bf16 %v647_v14, %v647_v14  ;;  %913 = vmatpush.bf16.msra.mxu3 %v1112_v6 }
 0x2cc   : > { %v794_v54 = vsub.f32 1.0, %v793_v53 }
 0x2ce   : > { %v795_v55 = vmul.f32 %v1207_v52, %v794_v54 }
 0x2d0   : > { %v796_v56 = vadd.f32 %v1207_v52, %v795_v55 }
 0x2d2   : > { %v798_v57 = vsel %vm797_vm5, %v1207_v52, %v796_v56 }
 0x2d3   : > { %v650_v16 = vpop.permute.xlu0 %649 }
 0x2d4   : > { %1065 = vmatmul.msk.bf16.vlgmr.msra.gmra.mxu2 %vm499_vm1, %v706_v15  ;;  %v655_v17 = vsel %vm537_vm2, %v650_v16, 0  ;;  %v1185_v15 = vld [vmem:[%s1598_s6] ss:$0 sm:$0xff] }
 0x2d5   : > { %664 = vmatpush.bf16.msrb.mxu1 %v655_v17 }
 0x2d8   : > { %1063 = vmatmul.msk.bf16.vlgmr.msrb.gmra.mxu1 %vm499_vm1, %v648_v18 }
 0x329   : > { %v550_v19 = vpop.f32.mrf.mxu2 }
 0x32a   : > { %v554_v39 = vpack.c.bf16 %v550_v19, %v550_v19 }
 0x331   : > { %v552_v20 = vpop.f32.mrf.mxu2 }
 0x332   : > { %v1111_v20 = vld [vmem:[%s1601_s9] sm:$0xff] }
 0x333   : > { %914 = vmatpush.bf16.msra.mxu3 %v1111_v20 }
 0x347   : > { %v608_v21 = vpop.f32.mrf.mxu2 }
 0x348   : > { %v612_v22 = vpack.c.bf16 %v608_v21, %v608_v21  ;;  %v1186_v21 = vld [vmem:[%s1600_s8] ss:$0 sm:$0xff] }
 0x34a   : > { %v730_v23 = vunpack.c.l.b16 %v612_v22 }
 0x34c   : > { %v731_v24 = vpack.c.b16 %v730_v23, %v730_v23 }
 0x34e   : > { %732 = vrot.lane.b32.xlu1 %v731_v24, %s1324_s7 }
 0x34f   : > { %v610_v25 = vpop.f32.mrf.mxu2 }
 0x355   : > { %v666_v26 = vpop.f32.mrf.mxu1 }
 0x356   : > { %v670_v27 = vpack.c.bf16 %v666_v26, %v666_v26 }
 0x357   : > { %v724_v28 = vpop.f32.mrf.mxu2 }
 0x358   : > { %v735_v29 = vunpack.c.l.b16 %v670_v27  ;;  %v728_v30 = vpack.c.bf16 %v724_v28, %v724_v28  ;;  %v1187_v27 = vld [vmem:[%s1602_s10] ss:$0 sm:$0xff] }
 0x35a   : > { %v736_v31 = vpack.c.b16 %v735_v29, %v735_v29  ;;  %v740_v32 = vunpack.c.l.b16 %v728_v30 }
 0x35c   : > { %v741_v33 = vpack.c.b16 %v740_v32, %v740_v32  ;;  %737 = vrot.lane.b32.xlu2 %v736_v31, %s1325_s27 }
 0x35d   : > { %v668_v34 = vpop.f32.mrf.mxu1 }
 0x35e   : > { %742 = vrot.lane.b32.xlu1 %v741_v33, %s1326_s17  ;;  %s448_s17 = scalar_lea.vmem [#allocation5], %s1047_s20  ;;  %s1262_s20 = scalar_lea.hbm %s1605_s13, 16 }
 0x35f   : > { %v726_v35 = vpop.f32.mrf.mxu2  ;;  %s967_s29 = sshll.u32 %s448_s17, 4  ;;  %p1264_p4 = scmp.lt.s32.totalorder %s1262_s20, %s1258_s21  ;;  %s968_s29 = int_to_ptr.vmem [resolvable:$true] %s967_s29 }
 0x361   : > { %p1265_p7 = por %p1264_p4, %p1263_p3 }
 0x363   : > { %p1266_p8 = pnand %p1265_p7, %p1261_p2 }
 0x3b6   : > { %v738_v41 = vpop.permute.xlu2 %737 }
 0x3c0   : > { %v733_v38 = vpop.permute.xlu1 %732 }
 0x3c1   : > { %v746_v40 = vsel %vm499_vm1, %v554_v39, %v733_v38 }
 0x3c2   : > { %v749_v43 = vsel %vm747_vm3, %v746_v40, %v738_v41 }
 0x3d0   : > { %v743_v42 = vpop.permute.xlu1 %742 }
 0x3d1   : > { %v752_v44 = vsel %vm750_vm4, %v749_v43, %v743_v42 }
 0x3d2   : > { %1074 = vmatmul.msk.bf16.vlgmr.msra.gmra.mxu0 %vm476_vm0, %v752_v44 }
 0x44f   : > { %v784_v46 = vpop.f32.mrf.mxu0 }
 0x450   : > { %v785_v47 = vadd.f32 %v1183_v45, %v784_v46 }
 0x452   : > { %v788_v48 = vadd.f32 %v785_v47, %v1467_v2  ;;  %v1110_v2 = vld [vmem:[#allocation2 + $0x8] sm:$0xff]  ;;  %v1188_v47 = vld [vmem:[%s1603_s11] ss:$0 sm:$0xff] }
 0x453   : > { %858 = vmatpush.bf16.msra.mxu1 %v1110_v2 }
 0x454   : > { %v789_v49 = vsel %vm476_vm0, %v788_v48, 0.0 }
 0x455   : > { %790 = vadd.xlane.f32.xlu2 %v789_v49 }
 0x457   : > { %v786_v50 = vpop.f32.mrf.mxu0  ;;  %859 = vmatpush.bf16.msra.mxu1 %v1109_v63 }
 0x458   : > { %v1189_v50 = vld [vmem:[%s1604_s12] ss:$0 sm:$0xff] }
 0x4c8   : > { %v791_v58 = vpop.xlane.xlu2 %790 }
 0x4c9   : > { %v799_v59 = vmul.f32 %v798_v57, %v791_v58 }
 0x4cb   : > { %v800_v60 = vsub.f32 %v788_v48, %v799_v59 }
 0x4cd   : > { %v801_v61 = vmul.f32 %v800_v60, %v800_v60 }
 0x4cf   : > { %v802_v62 = vsel %vm476_vm0, %v801_v61, 0.0 }
 0x4d0   : > { %803 = vadd.xlane.f32.xlu1 %v802_v62 }
 0x543   : > { %v804_v1 = vpop.xlane.xlu1 %803 }
 0x544   : > { %v805_v3 = vmul.f32 %v804_v1, %v798_v57 }
 0x546   : > { %v806_v5 = vadd.f32 1e-05, %v805_v3 }
 0x548   : > { %1208 = vrsqrt.f32 %v806_v5  ;;  %vm813_vm7 = vweird.f32 %v806_v5 }
 0x54e   : > { %v1209_v7 = vpop.eup %1208 }
 0x54f   : > { %v808_v8 = vmul.f32 %v1209_v7, %v806_v5  ;;  %vm814_vm6 = vweird.f32 %v1209_v7 }
 0x550   : > { %vm815_vm8 = vmor %vm813_vm7, %vm814_vm6 }
 0x551   : > { %v809_v9 = vmul.f32 %v1209_v7, %v808_v8 }
 0x553   : > { %v810_v10 = vmul.f32 0.5, %v809_v9 }
 0x555   : > { %v811_v11 = vsub.f32 1.5, %v810_v10 }
 0x557   : > { %v812_v12 = vmul.f32 %v1209_v7, %v811_v11 }
 0x559   : > { %v816_v14 = vsel %vm815_vm8, %v1209_v7, %v812_v12 }
 0x55a   : > { %v817_v16 = vmul.f32 %v816_v14, %v800_v60 }
 0x55c   : > { %v822_v17 = vmul.f32 %v1184_v13, %v817_v16 }
 0x55e   : > { %v827_v18 = vadd.f32 %v1185_v15, %v822_v17 }
 0x560   : > { %v828_v19 = vpack.c.bf16 %v827_v18, %v827_v18 }
 0x562   : > { %1083 = vmatmul.msk.bf16.vlgmr.msra.gmra.mxu1 %vm476_vm0, %v828_v19 }
 0x5df   : > { %v861_v22 = vpop.f32.mrf.mxu1 }
 0x5e0   : > { %v862_v23 = vadd.f32 %v1186_v21, %v861_v22 }
 0x5e2   : > { %v865_v24 = vmax.f32 %v862_v23, 0.0 }
 0x5e4   : > { %v866_v25 = vpack.c.bf16 %v865_v24, %v865_v24 }
 0x5e6   : > { %1100 = vmatmul.msk.bf16.vlgmr.msra.gmra.mxu3 %vm903_vm9, %v866_v25 }
 0x5e7   : > { %v863_v26 = vpop.f32.mrf.mxu1 }
 0x669   : > { %v916_v28 = vpop.f32.mrf.mxu3 }
 0x66a   : > { %v917_v29 = vadd.f32 %v1187_v27, %v916_v28 }
 0x66c   : > { %v920_v30 = vadd.f32 %v917_v29, %v827_v18 }
 0x66e   : > { %v921_v31 = vsel %vm476_vm0, %v920_v30, 0.0 }
 0x66f   : > { %922 = vadd.xlane.f32.xlu0 %v921_v31 }
 0x671   : > { %v918_v32 = vpop.f32.mrf.mxu3 }
 0x6e2   : > { %v923_v33 = vpop.xlane.xlu0 %922 }
 0x6e3   : > { %v924_v34 = vmul.f32 %v923_v33, %v798_v57 }
 0x6e5   : > { %v925_v35 = vsub.f32 %v920_v30, %v924_v34 }
 0x6e7   : > { %v926_v36 = vmul.f32 %v925_v35, %v925_v35 }
 0x6e9   : > { %v927_v37 = vsel %vm476_vm0, %v926_v36, 0.0 }
 0x6ea   : > { %928 = vadd.xlane.f32.xlu2 %v927_v37 }
 0x75d   : > { %v929_v38 = vpop.xlane.xlu2 %928 }
 0x75e   : > { %v930_v39 = vmul.f32 %v929_v38, %v798_v57 }
 0x760   : > { %v931_v40 = vadd.f32 1e-05, %v930_v39 }
 0x762   : > { %1210 = vrsqrt.f32 %v931_v40  ;;  %vm938_vm11 = vweird.f32 %v931_v40 }
 0x768   : > { %v1211_v41 = vpop.eup %1210 }
 0x769   : > { %v933_v42 = vmul.f32 %v1211_v41, %v931_v40  ;;  %vm939_vm10 = vweird.f32 %v1211_v41 }
 0x76a   : > { %vm940_vm12 = vmor %vm938_vm11, %vm939_vm10 }
 0x76b   : > { %v934_v43 = vmul.f32 %v1211_v41, %v933_v42 }
 0x76d   : > { %v935_v44 = vmul.f32 0.5, %v934_v43 }
 0x76f   : > { %v936_v45 = vsub.f32 1.5, %v935_v44 }
 0x771   : > { %v937_v46 = vmul.f32 %v1211_v41, %v936_v45 }
 0x773   : > { %v941_v48 = vsel %vm940_vm12, %v1211_v41, %v937_v46 }
 0x774   : > { %v942_v49 = vmul.f32 %v941_v48, %v925_v35 }
 0x776   : > { %v947_v51 = vmul.f32 %v1188_v47, %v942_v49 }
 0x778   : > { %v952_v52 = vadd.f32 %v1189_v50, %v947_v51 }
 0x77a   : > { %953 = vst.msk [vmem:[%s448_s17] sm:$0xff] %vm476_vm0, %v952_v52 }
 0x77b   : > { %1269 = shalt.err (!%p1266_p8)
}
 0x77c   : > { %1119 = dma.vmem_to_hbm [thread:$0]  (%p1436_p5), %s968_s29, 128, %s970_s0, %s955_s23  }
 0x77d PF: > { %p1131_p9 = scmp.ge.s32.totalorder %s1308_s28, 2  ;;  %s981_s16 = sand.u32 1, %s1296_s25  }
 0x77e   : > { %s982_s27 = scalar_lea.sflag [#allocation4], %s981_s16 }
 0x77f   : > { %p1126_p10 = pnand %p1131_p9, %p1440_p6 }
 0x781   : > { %p1127_p11 = pneg %p1126_p10 }
 0x783   : > { %1291 = dma.done.wait (%p1127_p11), %s982_s27, 128  }
 0x784   : > { %1293 = vsyncadd (%p1127_p11), %s982_s27, 4294967168  ;;  %s1615_s17 = sld [smem:[#allocation8_spill]]  ;;  %p24_p12 = scmp.ge.s32.totalorder %s1423_s14, 4  }
 0x785   : > { %s1616_s27 = sld [smem:[#allocation9_spill]]  ;;  %s1617_s25 = smov %s1300_s26 }
 0x786   : > { %s1619_s28 = smov %s1423_s14  ;;  %26 = sbr.rel (!%p24_p12) target bundleno = 7 (0x7), region = 112 }
 0x78a   : > { %s1618_s26 = smov %s1615_s17 }
 0x78b   :  { %988 = vsyncpa [#allocation3], 1 }
 0x78c   :  { %990 = vsyncpa [#allocation3 + $0x1], 1 }
 0x78d   :  { %991 = vsyncpa [#allocation4], 1 }
 0x78e   :  { %993 = vsyncpa [#allocation4 + $0x1], 1 }

</bundles_post_ra>
